<compile_context>
chip_gen: v7x
topology: tpu7x:2x2x1
jax: 0.10.0
libtpu: 0.0.40
codegen_flags: <defaults>
</compile_context>

<pallas_src>
import functools

import numpy as np
import jax
import jax.numpy as jnp
from jax import lax
from jax.experimental import pallas as pl
from jax.experimental.pallas import tpu as pltpu

EPS = 1e-5


def _vmem_limit_bytes():
    """Generation-aware VMEM budget: ~3/4 of physical capacity, clamped to
    [32 MiB, 96 MiB] (v5e/v6e: 128 MiB physical -> 96 MiB, v7x: 64 MiB -> 48 MiB)."""
    cap = None
    try:
        cap = getattr(pltpu.get_tpu_info(), "vmem_capacity_bytes", None)
    except Exception:
        cap = None
    if not cap:
        cap = 64 * 1024 * 1024
    return int(max(32 * 1024 * 1024, min(cap * 3 // 4, 96 * 1024 * 1024)))


def _pick_tile_h(H_out, W_out, W_pad, C_in_p, C_out, k, itemsize, vmem_limit):
    """Largest divisor of H_out whose per-tile working set fits the VMEM budget.
    The output tile (tile_h*W_out lanes) must be a multiple of 128 or the full
    extent (a full-extent block is always a legal BlockSpec)."""
    budget = vmem_limit // 3
    best = None
    for th in range(1, min(H_out, 64) + 1):          # cap bounds the store unroll
        if H_out % th:
            continue
        tile_m, out_l, slab_len = th * W_out, th * W_pad, (th + k) * W_pad
        need = (2 * C_in_p * slab_len * itemsize        # double-buffered halo slab
                + k * k * C_in_p * out_l * itemsize     # im2col scratch
                + 3 * C_out * out_l * 4                 # accumulator + temporaries
                + 2 * C_out * tile_m * 4)               # double-buffered output tile
        if need > budget:
            continue
        if tile_m % 128 == 0 or th == H_out:
            best = th
    return best if best is not None else H_out


def _fill_im2col(slab, xstk_ref, *, k, C_in_p, W_pad, out_L):
    """Stack the k*k statically-shifted views of the flat halo slab along sublanes
    into the (k*k*C_in_p, out_L) im2col scratch (all offsets static, 8-row aligned)."""
    for kh in range(k):
        for kw in range(k):
            tap = kh * k + kw
            off = kh * W_pad + kw
            xstk_ref[tap * C_in_p:(tap + 1) * C_in_p, :] = slab[:, off:off + out_L]


def _conv_stats_kernel(x_ref, w_ref, mask_ref, stats_ref, xstk_ref,
                       *, k, C_in_p, W_pad, W_out, tile_h, out_L):
    """Pass 1: one wide MXU contraction per row-tile + per-tile channel statistics.

    x_ref    : (1, 1, C_in_p, (tile_h+k)*W_pad)  pre-windowed halo slab (static access)
    w_ref    : (C_out, k*k*C_in_p)               tap-major im2col weights
    mask_ref : (1, out_L)                        1.0 on valid columns, 0.0 on gutters
    stats_ref: (1, C_out, 2)                     [...,0]=sum, [...,1]=centered sumsq
    xstk_ref : (k*k*C_in_p, out_L)               VMEM im2col scratch
    """
    slab = x_ref[0, 0]                                   # (C_in_p, slab_len)
    _fill_im2col(slab, xstk_ref, k=k, C_in_p=C_in_p, W_pad=W_pad, out_L=out_L)
    # NOTE: conv bias intentionally omitted; training-mode BatchNorm cancels it.
    acc = jnp.dot(w_ref[...], xstk_ref[...], preferred_element_type=jnp.float32)
    m = mask_ref[...]                                    # (1, out_L)
    inv_n = 1.0 / float(tile_h * W_out)
    s = jnp.sum(acc * m, axis=1, keepdims=True)          # (C_out, 1)
    d = (acc - s * inv_n) * m                            # centered on the tile mean
    stats_ref[0, :, 0:1] = s
    stats_ref[0, :, 1:2] = jnp.sum(d * d, axis=1, keepdims=True)


def _conv_bn_elu_kernel(x_ref, w_ref, scale_ref, shift_ref, o_ref, xstk_ref,
                        *, k, C_in_p, W_pad, W_out, tile_h, out_L):
    """Pass 2: recompute the conv, apply folded BN affine + ELU, store the row-tile."""
    slab = x_ref[0, 0]
    _fill_im2col(slab, xstk_ref, k=k, C_in_p=C_in_p, W_pad=W_pad, out_L=out_L)
    acc = jnp.dot(w_ref[...], xstk_ref[...], preferred_element_type=jnp.float32)
    z = acc * scale_ref[...] + shift_ref[...]            # folded BN affine
    # ELU(alpha=1); exp(z)-1 kept on the guaranteed-supported unary
    # (expm1 would be marginally more accurate near 0).
    e = jnp.where(z > 0.0, z, jnp.exp(z) - 1.0)
    # Strip the (k-1)-wide gutters; the output block itself is lane-dense.
    for r in range(tile_h):
        o_ref[0, :, r * W_out:(r + 1) * W_out] = e[:, r * W_pad:r * W_pad + W_out]


def _conv_bn_elu_impl(x_nchw, weight, bias, gamma, beta, kernel_size, stride,
                      tile_h=None, compute_dtype=jnp.float32):
    """Forward pass of the `conv` module (training-mode BatchNorm).

    x_nchw : (N, C_in, H, W) f32,  weight: (C_out, C_in, k, k),  bias: (C_out,)
    gamma, beta : (C_out,) BatchNorm affine parameters.
    """
    del bias  # cancelled exactly by training-mode BatchNorm mean subtraction
    N, C_in, H, W = x_nchw.shape
    C_out = weight.shape[0]
    k = int(kernel_size)
    p = (k - 1) // 2
    if stride != 1:
        # TODO(synk): stride > 1 needs a lane-subsampled store / strided tap gather.
        raise NotImplementedError("Pallas path implemented for stride == 1")

    H_out = H + 2 * p - k + 1
    W_out = W + 2 * p - k + 1
    W_pad = W + 2 * p
    C_in_p = ((C_in + 7) // 8) * 8                       # sublane-aligned channels

    itemsize = jnp.dtype(compute_dtype).itemsize
    vmem_limit = _vmem_limit_bytes()
    if tile_h is None:
        tile_h = _pick_tile_h(H_out, W_out, W_pad, C_in_p, C_out, k, itemsize,
                              vmem_limit)
    assert H_out % tile_h == 0
    n_ht = H_out // tile_h
    tile_m = tile_h * W_out
    out_L = tile_h * W_pad
    slab_len = (tile_h + k) * W_pad

    # Pad channels to C_in_p and pad spatially; the one extra zero bottom row covers
    # the flat-slab overrun of the last row-tile (never touches valid outputs).
    # TODO(synk): for very large inputs fuse the pad/windowing into the kernel
    # (allow_input_fusion or an in-kernel halo DMA) to avoid this host-side copy.
    x_pad = jnp.pad(x_nchw.astype(jnp.float32),
                    ((0, 0), (0, C_in_p - C_in), (p, p + 1), (p, p)))
    x_tiles = jnp.stack(
        [x_pad[:, :, t * tile_h: t * tile_h + tile_h + k, :] for t in range(n_ht)],
        axis=1)                                          # (N, n_ht, C_in_p, th+k, W_pad)
    x_tiles = x_tiles.reshape(N, n_ht, C_in_p, slab_len).astype(compute_dtype)

    # Tap-major im2col weights: column = (kh*k + kw)*C_in_p + ci.
    w_p = jnp.pad(weight.astype(jnp.float32),
                  ((0, 0), (0, C_in_p - C_in), (0, 0), (0, 0)))
    w2 = jnp.transpose(w_p, (0, 2, 3, 1)).reshape(C_out, k * k * C_in_p)
    w2 = w2.astype(compute_dtype)

    # Validity mask over the gutter layout (1.0 on the W_out real columns per row).
    mask_np = np.zeros((1, out_L), np.float32)
    for r in range(tile_h):
        mask_np[0, r * W_pad: r * W_pad + W_out] = 1.0
    mask = jnp.asarray(mask_np)

    cparams = pltpu.CompilerParams(
        dimension_semantics=("parallel", "parallel"),    # megacore sharding on v7x
        vmem_limit_bytes=vmem_limit)
    grid = (N, n_ht)
    x_spec = pl.BlockSpec((1, 1, C_in_p, slab_len), lambda n, t: (n, t, 0, 0))
    w_spec = pl.BlockSpec((C_out, k * k * C_in_p), lambda n, t: (0, 0))
    scratch = [pltpu.VMEM((k * k * C_in_p, out_L), compute_dtype)]

    # ---- Pass 1: conv -> per-tile channel sum / centered sum-of-squares only ------
    kern1 = functools.partial(_conv_stats_kernel, k=k, C_in_p=C_in_p, W_pad=W_pad,
                              W_out=W_out, tile_h=tile_h, out_L=out_L)
    stats = pl.pallas_call(
        kern1, grid=grid,
        in_specs=[x_spec, w_spec, pl.BlockSpec((1, out_L), lambda n, t: (0, 0))],
        out_specs=pl.BlockSpec((1, C_out, 2), lambda n, t: (n * n_ht + t, 0, 0)),
        out_shape=jax.ShapeDtypeStruct((N * n_ht, C_out, 2), jnp.float32),
        scratch_shapes=scratch, compiler_params=cparams,
    )(x_tiles, w2, mask)

    # ---- Exact batch statistics: Chan parallel combine of the per-tile partials ---
    n_tile = tile_h * W_out
    M = N * n_ht * n_tile                                # = N * H_out * W_out
    sums = stats[:, :, 0]                                # (T, C_out)
    m2s = stats[:, :, 1]
    mean = jnp.sum(sums, axis=0) / M
    mean_t = sums / n_tile
    m2 = jnp.sum(m2s, axis=0) + n_tile * jnp.sum((mean_t - mean[None, :]) ** 2, axis=0)
    var = m2 / M                                         # biased, as BN training mode
    scale_v = gamma.astype(jnp.float32) * lax.rsqrt(var + EPS)
    shift_v = beta.astype(jnp.float32) - mean * scale_v
    scale = scale_v.reshape(C_out, 1)
    shift = shift_v.reshape(C_out, 1)

    # ---- Pass 2: recompute conv, folded BN affine + ELU, lane-dense output --------
    kern2 = functools.partial(_conv_bn_elu_kernel, k=k, C_in_p=C_in_p, W_pad=W_pad,
                              W_out=W_out, tile_h=tile_h, out_L=out_L)
    out = pl.pallas_call(
        kern2, grid=grid,
        in_specs=[x_spec, w_spec,
                  pl.BlockSpec((C_out, 1), lambda n, t: (0, 0)),
                  pl.BlockSpec((C_out, 1), lambda n, t: (0, 0))],
        out_specs=pl.BlockSpec((1, C_out, tile_m), lambda n, t: (n, 0, t)),
        out_shape=jax.ShapeDtypeStruct((N, C_out, H_out * W_out), jnp.float32),
        scratch_shapes=scratch, compiler_params=cparams,
    )(x_tiles, w2, scale, shift)

    # (N, C_out, H_out*W_out) -> NCHW; no transpose needed.
    return out.reshape(N, C_out, H_out, W_out)


conv_bn_elu = jax.jit(
    _conv_bn_elu_impl,
    static_argnames=("kernel_size", "stride", "tile_h", "compute_dtype"))


def _reference(x_nchw, weight, bias, gamma, beta, kernel_size, stride):
    """Pure-JAX reference mirroring the PyTorch forward (including the conv bias)."""
    k = kernel_size
    p = int(np.floor((k - 1) / 2))
    x = jnp.pad(x_nchw, ((0, 0), (0, 0), (p, p), (p, p)))
    y = lax.conv_general_dilated(
        x, weight, window_strides=(stride, stride), padding="VALID",
        dimension_numbers=("NCHW", "OIHW", "NCHW"))
    y = y + bias.reshape(1, -1, 1, 1)
    mean = jnp.mean(y, axis=(0, 2, 3), keepdims=True)
    var = jnp.mean((y - mean) ** 2, axis=(0, 2, 3), keepdims=True)
    y = (y - mean) / jnp.sqrt(var + EPS)
    y = gamma.reshape(1, -1, 1, 1) * y + beta.reshape(1, -1, 1, 1)
    return jnp.where(y > 0, y, jnp.exp(y) - 1.0)


if __name__ == "__main__":
    # Module config: conv(num_in_layers=4, num_out_layers=8, kernel_size=3, stride=1)
    N, C_in, H, W = 2, 4, 16, 16
    C_out, k, stride = 8, 3, 1

    key = jax.random.PRNGKey(0)
    kx, kw_, kb = jax.random.split(key, 3)

    x = jax.random.normal(kx, (N, C_in, H, W), dtype=jnp.float32)
    fan_in = C_in * k * k
    bound = 1.0 / np.sqrt(fan_in)
    weight = jax.random.uniform(kw_, (C_out, C_in, k, k),
                                minval=-bound, maxval=bound, dtype=jnp.float32)
    bias = jax.random.uniform(kb, (C_out,),
                              minval=-bound, maxval=bound, dtype=jnp.float32)
    gamma = jnp.ones((C_out,), dtype=jnp.float32)    # BatchNorm weight init
    beta = jnp.zeros((C_out,), dtype=jnp.float32)    # BatchNorm bias init

    ref = _reference(x, weight, bias, gamma, beta, k, stride)

    # f32 MXU path, auto tile size (one row-tile per image at this size).
    out = jax.block_until_ready(
        conv_bn_elu(x, weight, bias, gamma, beta, kernel_size=k, stride=stride))
    np.testing.assert_allclose(np.asarray(out), np.asarray(ref), rtol=1e-4, atol=1e-4)

    # Multi-row-tile path (n_ht = 2): exercises the Chan partial-stats combine.
    out2 = jax.block_until_ready(
        conv_bn_elu(x, weight, bias, gamma, beta, kernel_size=k, stride=stride,
                    tile_h=8))
    np.testing.assert_allclose(np.asarray(out2), np.asarray(ref), rtol=1e-4, atol=1e-4)

    # bf16 MXU operands (f32 accumulation): looser tolerance vs the f32 reference.
    out3 = jax.block_until_ready(
        conv_bn_elu(x, weight, bias, gamma, beta, kernel_size=k, stride=stride,
                    compute_dtype=jnp.bfloat16))
    np.testing.assert_allclose(np.asarray(out3), np.asarray(ref), rtol=5e-2, atol=5e-2)

    print("KERNEL_OK")
</pallas_src>

<mosaic_0001>
module attributes {stable_mosaic.version = 11 : i64} {
  func.func @_conv_stats_kernel(%arg0: i32, %arg1: i32, %arg2: memref<1x1x8x342xf32, #tpu.memory_space<vmem>>, %arg3: memref<8x72xf32, #tpu.memory_space<vmem>>, %arg4: memref<1x288xf32, #tpu.memory_space<vmem>>, %arg5: memref<1x8x2xf32, #tpu.memory_space<vmem>>, %arg6: memref<72x288xf32, #tpu.memory_space<vmem>>) attributes {dimension_semantics = [#tpu.dimension_semantics<parallel>, #tpu.dimension_semantics<parallel>], iteration_bounds = array<i64: 2, 1>, scalar_prefetch = 0 : i64, scratch_operands = 1 : i64, tpu.core_type = #tpu.core_type<tc>, window_params = [{transform_indices = @transform_0, window_bounds = array<i64: 1, 1, 8, 342>}, {pipeline_mode = #tpu.pipeline_mode<synchronous>, transform_indices = @transform_1, window_bounds = array<i64: 8, 72>}, {pipeline_mode = #tpu.pipeline_mode<synchronous>, transform_indices = @transform_2, window_bounds = array<i64: 1, 288>}, {transform_indices = @transform_3, window_bounds = array<i64: 1, 8, 2>}]} {
    %c0 = arith.constant 0 : index
    %c0_0 = arith.constant 0 : index
    %c0_1 = arith.constant 0 : index
    %c0_2 = arith.constant 0 : index
    %0 = vector.load %arg2[%c0, %c0_0, %c0_1, %c0_2] : memref<1x1x8x342xf32, #tpu.memory_space<vmem>>, vector<1x1x8x342xf32>
    %1 = vector.shape_cast %0 : vector<1x1x8x342xf32> to vector<8x342xf32>
    %2 = vector.extract_strided_slice %1 {offsets = [0, 0], sizes = [8, 288], strides = [1, 1]} : vector<8x342xf32> to vector<8x288xf32>
    %c0_3 = arith.constant 0 : index
    %c0_4 = arith.constant 0 : index
    %3 = vector.load %arg6[%c0_3, %c0_4] : memref<72x288xf32, #tpu.memory_space<vmem>>, vector<8x288xf32>
    tpu.vector_store %arg6[%c0_3, %c0_4], %2 {strides = array<i32>} : memref<72x288xf32, #tpu.memory_space<vmem>>, vector<8x288xf32>,
    %4 = vector.extract_strided_slice %1 {offsets = [0, 1], sizes = [8, 288], strides = [1, 1]} : vector<8x342xf32> to vector<8x288xf32>
    %c8 = arith.constant 8 : index
    %c0_5 = arith.constant 0 : index
    %5 = vector.load %arg6[%c8, %c0_5] : memref<72x288xf32, #tpu.memory_space<vmem>>, vector<8x288xf32>
    tpu.vector_store %arg6[%c8, %c0_5], %4 {strides = array<i32>} : memref<72x288xf32, #tpu.memory_space<vmem>>, vector<8x288xf32>,
    %6 = vector.extract_strided_slice %1 {offsets = [0, 2], sizes = [8, 288], strides = [1, 1]} : vector<8x342xf32> to vector<8x288xf32>
    %c16 = arith.constant 16 : index
    %c0_6 = arith.constant 0 : index
    %7 = vector.load %arg6[%c16, %c0_6] : memref<72x288xf32, #tpu.memory_space<vmem>>, vector<8x288xf32>
    tpu.vector_store %arg6[%c16, %c0_6], %6 {strides = array<i32>} : memref<72x288xf32, #tpu.memory_space<vmem>>, vector<8x288xf32>,
    %8 = vector.extract_strided_slice %1 {offsets = [0, 18], sizes = [8, 288], strides = [1, 1]} : vector<8x342xf32> to vector<8x288xf32>
    %c24 = arith.constant 24 : index
    %c0_7 = arith.constant 0 : index
    %9 = vector.load %arg6[%c24, %c0_7] : memref<72x288xf32, #tpu.memory_space<vmem>>, vector<8x288xf32>
    tpu.vector_store %arg6[%c24, %c0_7], %8 {strides = array<i32>} : memref<72x288xf32, #tpu.memory_space<vmem>>, vector<8x288xf32>,
    %10 = vector.extract_strided_slice %1 {offsets = [0, 19], sizes = [8, 288], strides = [1, 1]} : vector<8x342xf32> to vector<8x288xf32>
    %c32 = arith.constant 32 : index
    %c0_8 = arith.constant 0 : index
    %11 = vector.load %arg6[%c32, %c0_8] : memref<72x288xf32, #tpu.memory_space<vmem>>, vector<8x288xf32>
    tpu.vector_store %arg6[%c32, %c0_8], %10 {strides = array<i32>} : memref<72x288xf32, #tpu.memory_space<vmem>>, vector<8x288xf32>,
    %12 = vector.extract_strided_slice %1 {offsets = [0, 20], sizes = [8, 288], strides = [1, 1]} : vector<8x342xf32> to vector<8x288xf32>
    %c40 = arith.constant 40 : index
    %c0_9 = arith.constant 0 : index
    %13 = vector.load %arg6[%c40, %c0_9] : memref<72x288xf32, #tpu.memory_space<vmem>>, vector<8x288xf32>
    tpu.vector_store %arg6[%c40, %c0_9], %12 {strides = array<i32>} : memref<72x288xf32, #tpu.memory_space<vmem>>, vector<8x288xf32>,
    %14 = vector.extract_strided_slice %1 {offsets = [0, 36], sizes = [8, 288], strides = [1, 1]} : vector<8x342xf32> to vector<8x288xf32>
    %c48 = arith.constant 48 : index
    %c0_10 = arith.constant 0 : index
    %15 = vector.load %arg6[%c48, %c0_10] : memref<72x288xf32, #tpu.memory_space<vmem>>, vector<8x288xf32>
    tpu.vector_store %arg6[%c48, %c0_10], %14 {strides = array<i32>} : memref<72x288xf32, #tpu.memory_space<vmem>>, vector<8x288xf32>,
    %16 = vector.extract_strided_slice %1 {offsets = [0, 37], sizes = [8, 288], strides = [1, 1]} : vector<8x342xf32> to vector<8x288xf32>
    %c56 = arith.constant 56 : index
    %c0_11 = arith.constant 0 : index
    %17 = vector.load %arg6[%c56, %c0_11] : memref<72x288xf32, #tpu.memory_space<vmem>>, vector<8x288xf32>
    tpu.vector_store %arg6[%c56, %c0_11], %16 {strides = array<i32>} : memref<72x288xf32, #tpu.memory_space<vmem>>, vector<8x288xf32>,
    %18 = vector.extract_strided_slice %1 {offsets = [0, 38], sizes = [8, 288], strides = [1, 1]} : vector<8x342xf32> to vector<8x288xf32>
    %c64 = arith.constant 64 : index
    %c0_12 = arith.constant 0 : index
    %19 = vector.load %arg6[%c64, %c0_12] : memref<72x288xf32, #tpu.memory_space<vmem>>, vector<8x288xf32>
    tpu.vector_store %arg6[%c64, %c0_12], %18 {strides = array<i32>} : memref<72x288xf32, #tpu.memory_space<vmem>>, vector<8x288xf32>,
    %c0_13 = arith.constant 0 : index
    %c0_14 = arith.constant 0 : index
    %20 = vector.load %arg3[%c0_13, %c0_14] : memref<8x72xf32, #tpu.memory_space<vmem>>, vector<8x72xf32>
    %c0_15 = arith.constant 0 : index
    %c0_16 = arith.constant 0 : index
    %21 = vector.load %arg6[%c0_15, %c0_16] : memref<72x288xf32, #tpu.memory_space<vmem>>, vector<72x288xf32>
    %cst = arith.constant dense<0.000000e+00> : vector<8x288xf32>
    %22 = tpu.matmul %20, %21, %cst {dimension_numbers = #tpu.dot_dimension_numbers<[1], [0], [0], [1], [0, 0, 1, 1], [], []>} : vector<8x72xf32>, vector<72x288xf32>, vector<8x288xf32> -> vector<8x288xf32>
    %c0_17 = arith.constant 0 : index
    %c0_18 = arith.constant 0 : index
    %23 = vector.load %arg4[%c0_17, %c0_18] : memref<1x288xf32, #tpu.memory_space<vmem>>, vector<1x288xf32>
    %24 = vector.broadcast %23 : vector<1x288xf32> to vector<8x288xf32>
    %25 = arith.mulf %22, %24 : vector<8x288xf32>
    %cst_19 = arith.constant dense<0.000000e+00> : vector<8xf32>
    %26 = vector.multi_reduction <add>, %25, %cst_19 [1] : vector<8x288xf32> to vector<8xf32>
    %27 = vector.shape_cast %26 : vector<8xf32> to vector<8x1xf32>
    %cst_20 = arith.constant 3.906250e-03 : f32
    %28 = vector.broadcast %cst_20 : f32 to vector<8x1xf32>
    %29 = arith.mulf %27, %28 : vector<8x1xf32>
    %30 = vector.broadcast %29 : vector<8x1xf32> to vector<8x288xf32>
    %31 = arith.subf %22, %30 : vector<8x288xf32>
    %32 = vector.broadcast %23 : vector<1x288xf32> to vector<8x288xf32>
    %33 = arith.mulf %31, %32 : vector<8x288xf32>
    %c0_21 = arith.constant 0 : index
    %c0_22 = arith.constant 0 : index
    %c0_23 = arith.constant 0 : index
    %34 = vector.load %arg5[%c0_21, %c0_22, %c0_23] : memref<1x8x2xf32, #tpu.memory_space<vmem>>, vector<1x8x1xf32>
    %35 = vector.shape_cast %34 : vector<1x8x1xf32> to vector<8x1xf32>
    %36 = vector.shape_cast %27 : vector<8x1xf32> to vector<1x8x1xf32>
    tpu.vector_store %arg5[%c0_21, %c0_22, %c0_23], %36 {strides = array<i32>} : memref<1x8x2xf32, #tpu.memory_space<vmem>>, vector<1x8x1xf32>,
    %37 = arith.mulf %33, %33 : vector<8x288xf32>
    %cst_24 = arith.constant dense<0.000000e+00> : vector<8xf32>
    %38 = vector.multi_reduction <add>, %37, %cst_24 [1] : vector<8x288xf32> to vector<8xf32>
    %39 = vector.shape_cast %38 : vector<8xf32> to vector<8x1xf32>
    %c0_25 = arith.constant 0 : index
    %c0_26 = arith.constant 0 : index
    %c1 = arith.constant 1 : index
    %40 = vector.load %arg5[%c0_25, %c0_26, %c1] : memref<1x8x2xf32, #tpu.memory_space<vmem>>, vector<1x8x1xf32>
    %41 = vector.shape_cast %40 : vector<1x8x1xf32> to vector<8x1xf32>
    %42 = vector.shape_cast %39 : vector<8x1xf32> to vector<1x8x1xf32>
    tpu.vector_store %arg5[%c0_25, %c0_26, %c1], %42 {strides = array<i32>} : memref<1x8x2xf32, #tpu.memory_space<vmem>>, vector<1x8x1xf32>,
    return
  }
  func.func @transform_0(%arg0: i32, %arg1: i32) -> (i32, i32, i32, i32) {
    %c0_i32 = arith.constant 0 : i32
    %c0_i32_0 = arith.constant 0 : i32
    %c0_i32_1 = arith.constant 0 : i32
    return %arg0, %arg1, %c0_i32, %c0_i32_0 : i32, i32, i32, i32
  }
  func.func @transform_1(%arg0: i32, %arg1: i32) -> (i32, i32) {
    %c0_i32 = arith.constant 0 : i32
    %c0_i32_0 = arith.constant 0 : i32
    %c0_i32_1 = arith.constant 0 : i32
    return %c0_i32, %c0_i32_0 : i32, i32
  }
  func.func @transform_2(%arg0: i32, %arg1: i32) -> (i32, i32) {
    %c0_i32 = arith.constant 0 : i32
    %c0_i32_0 = arith.constant 0 : i32
    %c0_i32_1 = arith.constant 0 : i32
    return %c0_i32, %c0_i32_0 : i32, i32
  }
  func.func @transform_3(%arg0: i32, %arg1: i32) -> (i32, i32, i32) {
    %c1_i32 = arith.constant 1 : i32
    %0 = arith.muli %arg0, %c1_i32 : i32
    %1 = arith.addi %0, %arg1 : i32
    %c0_i32 = arith.constant 0 : i32
    %c0_i32_0 = arith.constant 0 : i32
    %c0_i32_1 = arith.constant 0 : i32
    return %1, %c0_i32, %c0_i32_0 : i32, i32, i32
  }
}

module attributes {stable_mosaic.version = 11 : i64} {
  func.func @_conv_bn_elu_kernel(%arg0: i32, %arg1: i32, %arg2: memref<1x1x8x342xf32, #tpu.memory_space<vmem>>, %arg3: memref<8x72xf32, #tpu.memory_space<vmem>>, %arg4: memref<8x1xf32, #tpu.memory_space<vmem>>, %arg5: memref<8x1xf32, #tpu.memory_space<vmem>>, %arg6: memref<1x8x256xf32, #tpu.memory_space<vmem>>, %arg7: memref<72x288xf32, #tpu.memory_space<vmem>>) attributes {dimension_semantics = [#tpu.dimension_semantics<parallel>, #tpu.dimension_semantics<parallel>], iteration_bounds = array<i64: 2, 1>, scalar_prefetch = 0 : i64, scratch_operands = 1 : i64, tpu.core_type = #tpu.core_type<tc>, window_params = [{transform_indices = @transform_0, window_bounds = array<i64: 1, 1, 8, 342>}, {pipeline_mode = #tpu.pipeline_mode<synchronous>, transform_indices = @transform_1, window_bounds = array<i64: 8, 72>}, {pipeline_mode = #tpu.pipeline_mode<synchronous>, transform_indices = @transform_2, window_bounds = array<i64: 8, 1>}, {pipeline_mode = #tpu.pipeline_mode<synchronous>, transform_indices = @transform_3, window_bounds = array<i64: 8, 1>}, {transform_indices = @transform_4, window_bounds = array<i64: 1, 8, 256>}]} {
    %c0 = arith.constant 0 : index
    %c0_0 = arith.constant 0 : index
    %c0_1 = arith.constant 0 : index
    %c0_2 = arith.constant 0 : index
    %0 = vector.load %arg2[%c0, %c0_0, %c0_1, %c0_2] : memref<1x1x8x342xf32, #tpu.memory_space<vmem>>, vector<1x1x8x342xf32>
    %1 = vector.shape_cast %0 : vector<1x1x8x342xf32> to vector<8x342xf32>
    %2 = vector.extract_strided_slice %1 {offsets = [0, 0], sizes = [8, 288], strides = [1, 1]} : vector<8x342xf32> to vector<8x288xf32>
    %c0_3 = arith.constant 0 : index
    %c0_4 = arith.constant 0 : index
    %3 = vector.load %arg7[%c0_3, %c0_4] : memref<72x288xf32, #tpu.memory_space<vmem>>, vector<8x288xf32>
    tpu.vector_store %arg7[%c0_3, %c0_4], %2 {strides = array<i32>} : memref<72x288xf32, #tpu.memory_space<vmem>>, vector<8x288xf32>,
    %4 = vector.extract_strided_slice %1 {offsets = [0, 1], sizes = [8, 288], strides = [1, 1]} : vector<8x342xf32> to vector<8x288xf32>
    %c8 = arith.constant 8 : index
    %c0_5 = arith.constant 0 : index
    %5 = vector.load %arg7[%c8, %c0_5] : memref<72x288xf32, #tpu.memory_space<vmem>>, vector<8x288xf32>
    tpu.vector_store %arg7[%c8, %c0_5], %4 {strides = array<i32>} : memref<72x288xf32, #tpu.memory_space<vmem>>, vector<8x288xf32>,
    %6 = vector.extract_strided_slice %1 {offsets = [0, 2], sizes = [8, 288], strides = [1, 1]} : vector<8x342xf32> to vector<8x288xf32>
    %c16 = arith.constant 16 : index
    %c0_6 = arith.constant 0 : index
    %7 = vector.load %arg7[%c16, %c0_6] : memref<72x288xf32, #tpu.memory_space<vmem>>, vector<8x288xf32>
    tpu.vector_store %arg7[%c16, %c0_6], %6 {strides = array<i32>} : memref<72x288xf32, #tpu.memory_space<vmem>>, vector<8x288xf32>,
    %8 = vector.extract_strided_slice %1 {offsets = [0, 18], sizes = [8, 288], strides = [1, 1]} : vector<8x342xf32> to vector<8x288xf32>
    %c24 = arith.constant 24 : index
    %c0_7 = arith.constant 0 : index
    %9 = vector.load %arg7[%c24, %c0_7] : memref<72x288xf32, #tpu.memory_space<vmem>>, vector<8x288xf32>
    tpu.vector_store %arg7[%c24, %c0_7], %8 {strides = array<i32>} : memref<72x288xf32, #tpu.memory_space<vmem>>, vector<8x288xf32>,
    %10 = vector.extract_strided_slice %1 {offsets = [0, 19], sizes = [8, 288], strides = [1, 1]} : vector<8x342xf32> to vector<8x288xf32>
    %c32 = arith.constant 32 : index
    %c0_8 = arith.constant 0 : index
    %11 = vector.load %arg7[%c32, %c0_8] : memref<72x288xf32, #tpu.memory_space<vmem>>, vector<8x288xf32>
    tpu.vector_store %arg7[%c32, %c0_8], %10 {strides = array<i32>} : memref<72x288xf32, #tpu.memory_space<vmem>>, vector<8x288xf32>,
    %12 = vector.extract_strided_slice %1 {offsets = [0, 20], sizes = [8, 288], strides = [1, 1]} : vector<8x342xf32> to vector<8x288xf32>
    %c40 = arith.constant 40 : index
    %c0_9 = arith.constant 0 : index
    %13 = vector.load %arg7[%c40, %c0_9] : memref<72x288xf32, #tpu.memory_space<vmem>>, vector<8x288xf32>
    tpu.vector_store %arg7[%c40, %c0_9], %12 {strides = array<i32>} : memref<72x288xf32, #tpu.memory_space<vmem>>, vector<8x288xf32>,
    %14 = vector.extract_strided_slice %1 {offsets = [0, 36], sizes = [8, 288], strides = [1, 1]} : vector<8x342xf32> to vector<8x288xf32>
    %c48 = arith.constant 48 : index
    %c0_10 = arith.constant 0 : index
    %15 = vector.load %arg7[%c48, %c0_10] : memref<72x288xf32, #tpu.memory_space<vmem>>, vector<8x288xf32>
    tpu.vector_store %arg7[%c48, %c0_10], %14 {strides = array<i32>} : memref<72x288xf32, #tpu.memory_space<vmem>>, vector<8x288xf32>,
    %16 = vector.extract_strided_slice %1 {offsets = [0, 37], sizes = [8, 288], strides = [1, 1]} : vector<8x342xf32> to vector<8x288xf32>
    %c56 = arith.constant 56 : index
    %c0_11 = arith.constant 0 : index
    %17 = vector.load %arg7[%c56, %c0_11] : memref<72x288xf32, #tpu.memory_space<vmem>>, vector<8x288xf32>
    tpu.vector_store %arg7[%c56, %c0_11], %16 {strides = array<i32>} : memref<72x288xf32, #tpu.memory_space<vmem>>, vector<8x288xf32>,
    %18 = vector.extract_strided_slice %1 {offsets = [0, 38], sizes = [8, 288], strides = [1, 1]} : vector<8x342xf32> to vector<8x288xf32>
    %c64 = arith.constant 64 : index
    %c0_12 = arith.constant 0 : index
    %19 = vector.load %arg7[%c64, %c0_12] : memref<72x288xf32, #tpu.memory_space<vmem>>, vector<8x288xf32>
    tpu.vector_store %arg7[%c64, %c0_12], %18 {strides = array<i32>} : memref<72x288xf32, #tpu.memory_space<vmem>>, vector<8x288xf32>,
    %c0_13 = arith.constant 0 : index
    %c0_14 = arith.constant 0 : index
    %20 = vector.load %arg3[%c0_13, %c0_14] : memref<8x72xf32, #tpu.memory_space<vmem>>, vector<8x72xf32>
    %c0_15 = arith.constant 0 : index
    %c0_16 = arith.constant 0 : index
    %21 = vector.load %arg7[%c0_15, %c0_16] : memref<72x288xf32, #tpu.memory_space<vmem>>, vector<72x288xf32>
    %cst = arith.constant dense<0.000000e+00> : vector<8x288xf32>
    %22 = tpu.matmul %20, %21, %cst {dimension_numbers = #tpu.dot_dimension_numbers<[1], [0], [0], [1], [0, 0, 1, 1], [], []>} : vector<8x72xf32>, vector<72x288xf32>, vector<8x288xf32> -> vector<8x288xf32>
    %c0_17 = arith.constant 0 : index
    %c0_18 = arith.constant 0 : index
    %23 = vector.load %arg4[%c0_17, %c0_18] : memref<8x1xf32, #tpu.memory_space<vmem>>, vector<8x1xf32>
    %24 = vector.broadcast %23 : vector<8x1xf32> to vector<8x288xf32>
    %25 = arith.mulf %22, %24 : vector<8x288xf32>
    %c0_19 = arith.constant 0 : index
    %c0_20 = arith.constant 0 : index
    %26 = vector.load %arg5[%c0_19, %c0_20] : memref<8x1xf32, #tpu.memory_space<vmem>>, vector<8x1xf32>
    %27 = vector.broadcast %26 : vector<8x1xf32> to vector<8x288xf32>
    %28 = arith.addf %25, %27 : vector<8x288xf32>
    %cst_21 = arith.constant 0.000000e+00 : f32
    %29 = vector.broadcast %cst_21 : f32 to vector<8x288xf32>
    %30 = arith.cmpf ogt, %28, %29 : vector<8x288xf32>
    %31 = math.exp %28 : vector<8x288xf32>
    %cst_22 = arith.constant 1.000000e+00 : f32
    %32 = vector.broadcast %cst_22 : f32 to vector<8x288xf32>
    %33 = arith.subf %31, %32 : vector<8x288xf32>
    %34 = arith.select %30, %28, %33 : vector<8x288xi1>, vector<8x288xf32>
    %35 = vector.extract_strided_slice %34 {offsets = [0, 0], sizes = [8, 16], strides = [1, 1]} : vector<8x288xf32> to vector<8x16xf32>
    %c0_23 = arith.constant 0 : index
    %c0_24 = arith.constant 0 : index
    %c0_25 = arith.constant 0 : index
    %36 = vector.load %arg6[%c0_23, %c0_24, %c0_25] : memref<1x8x256xf32, #tpu.memory_space<vmem>>, vector<1x8x16xf32>
    %37 = vector.shape_cast %36 : vector<1x8x16xf32> to vector<8x16xf32>
    %38 = vector.shape_cast %35 : vector<8x16xf32> to vector<1x8x16xf32>
    tpu.vector_store %arg6[%c0_23, %c0_24, %c0_25], %38 {strides = array<i32>} : memref<1x8x256xf32, #tpu.memory_space<vmem>>, vector<1x8x16xf32>,
    %39 = vector.extract_strided_slice %34 {offsets = [0, 18], sizes = [8, 16], strides = [1, 1]} : vector<8x288xf32> to vector<8x16xf32>
    %c0_26 = arith.constant 0 : index
    %c0_27 = arith.constant 0 : index
    %c16_28 = arith.constant 16 : index
    %40 = vector.load %arg6[%c0_26, %c0_27, %c16_28] : memref<1x8x256xf32, #tpu.memory_space<vmem>>, vector<1x8x16xf32>
    %41 = vector.shape_cast %40 : vector<1x8x16xf32> to vector<8x16xf32>
    %42 = vector.shape_cast %39 : vector<8x16xf32> to vector<1x8x16xf32>
    tpu.vector_store %arg6[%c0_26, %c0_27, %c16_28], %42 {strides = array<i32>} : memref<1x8x256xf32, #tpu.memory_space<vmem>>, vector<1x8x16xf32>,
    %43 = vector.extract_strided_slice %34 {offsets = [0, 36], sizes = [8, 16], strides = [1, 1]} : vector<8x288xf32> to vector<8x16xf32>
    %c0_29 = arith.constant 0 : index
    %c0_30 = arith.constant 0 : index
    %c32_31 = arith.constant 32 : index
    %44 = vector.load %arg6[%c0_29, %c0_30, %c32_31] : memref<1x8x256xf32, #tpu.memory_space<vmem>>, vector<1x8x16xf32>
    %45 = vector.shape_cast %44 : vector<1x8x16xf32> to vector<8x16xf32>
    %46 = vector.shape_cast %43 : vector<8x16xf32> to vector<1x8x16xf32>
    tpu.vector_store %arg6[%c0_29, %c0_30, %c32_31], %46 {strides = array<i32>} : memref<1x8x256xf32, #tpu.memory_space<vmem>>, vector<1x8x16xf32>,
    %47 = vector.extract_strided_slice %34 {offsets = [0, 54], sizes = [8, 16], strides = [1, 1]} : vector<8x288xf32> to vector<8x16xf32>
    %c0_32 = arith.constant 0 : index
    %c0_33 = arith.constant 0 : index
    %c48_34 = arith.constant 48 : index
    %48 = vector.load %arg6[%c0_32, %c0_33, %c48_34] : memref<1x8x256xf32, #tpu.memory_space<vmem>>, vector<1x8x16xf32>
    %49 = vector.shape_cast %48 : vector<1x8x16xf32> to vector<8x16xf32>
    %50 = vector.shape_cast %47 : vector<8x16xf32> to vector<1x8x16xf32>
    tpu.vector_store %arg6[%c0_32, %c0_33, %c48_34], %50 {strides = array<i32>} : memref<1x8x256xf32, #tpu.memory_space<vmem>>, vector<1x8x16xf32>,
    %51 = vector.extract_strided_slice %34 {offsets = [0, 72], sizes = [8, 16], strides = [1, 1]} : vector<8x288xf32> to vector<8x16xf32>
    %c0_35 = arith.constant 0 : index
    %c0_36 = arith.constant 0 : index
    %c64_37 = arith.constant 64 : index
    %52 = vector.load %arg6[%c0_35, %c0_36, %c64_37] : memref<1x8x256xf32, #tpu.memory_space<vmem>>, vector<1x8x16xf32>
    %53 = vector.shape_cast %52 : vector<1x8x16xf32> to vector<8x16xf32>
    %54 = vector.shape_cast %51 : vector<8x16xf32> to vector<1x8x16xf32>
    tpu.vector_store %arg6[%c0_35, %c0_36, %c64_37], %54 {strides = array<i32>} : memref<1x8x256xf32, #tpu.memory_space<vmem>>, vector<1x8x16xf32>,
    %55 = vector.extract_strided_slice %34 {offsets = [0, 90], sizes = [8, 16], strides = [1, 1]} : vector<8x288xf32> to vector<8x16xf32>
    %c0_38 = arith.constant 0 : index
    %c0_39 = arith.constant 0 : index
    %c80 = arith.constant 80 : index
    %56 = vector.load %arg6[%c0_38, %c0_39, %c80] : memref<1x8x256xf32, #tpu.memory_space<vmem>>, vector<1x8x16xf32>
    %57 = vector.shape_cast %56 : vector<1x8x16xf32> to vector<8x16xf32>
    %58 = vector.shape_cast %55 : vector<8x16xf32> to vector<1x8x16xf32>
    tpu.vector_store %arg6[%c0_38, %c0_39, %c80], %58 {strides = array<i32>} : memref<1x8x256xf32, #tpu.memory_space<vmem>>, vector<1x8x16xf32>,
    %59 = vector.extract_strided_slice %34 {offsets = [0, 108], sizes = [8, 16], strides = [1, 1]} : vector<8x288xf32> to vector<8x16xf32>
    %c0_40 = arith.constant 0 : index
    %c0_41 = arith.constant 0 : index
    %c96 = arith.constant 96 : index
    %60 = vector.load %arg6[%c0_40, %c0_41, %c96] : memref<1x8x256xf32, #tpu.memory_space<vmem>>, vector<1x8x16xf32>
    %61 = vector.shape_cast %60 : vector<1x8x16xf32> to vector<8x16xf32>
    %62 = vector.shape_cast %59 : vector<8x16xf32> to vector<1x8x16xf32>
    tpu.vector_store %arg6[%c0_40, %c0_41, %c96], %62 {strides = array<i32>} : memref<1x8x256xf32, #tpu.memory_space<vmem>>, vector<1x8x16xf32>,
    %63 = vector.extract_strided_slice %34 {offsets = [0, 126], sizes = [8, 16], strides = [1, 1]} : vector<8x288xf32> to vector<8x16xf32>
    %c0_42 = arith.constant 0 : index
    %c0_43 = arith.constant 0 : index
    %c112 = arith.constant 112 : index
    %64 = vector.load %arg6[%c0_42, %c0_43, %c112] : memref<1x8x256xf32, #tpu.memory_space<vmem>>, vector<1x8x16xf32>
    %65 = vector.shape_cast %64 : vector<1x8x16xf32> to vector<8x16xf32>
    %66 = vector.shape_cast %63 : vector<8x16xf32> to vector<1x8x16xf32>
    tpu.vector_store %arg6[%c0_42, %c0_43, %c112], %66 {strides = array<i32>} : memref<1x8x256xf32, #tpu.memory_space<vmem>>, vector<1x8x16xf32>,
    %67 = vector.extract_strided_slice %34 {offsets = [0, 144], sizes = [8, 16], strides = [1, 1]} : vector<8x288xf32> to vector<8x16xf32>
    %c0_44 = arith.constant 0 : index
    %c0_45 = arith.constant 0 : index
    %c128 = arith.constant 128 : index
    %68 = vector.load %arg6[%c0_44, %c0_45, %c128] : memref<1x8x256xf32, #tpu.memory_space<vmem>>, vector<1x8x16xf32>
    %69 = vector.shape_cast %68 : vector<1x8x16xf32> to vector<8x16xf32>
    %70 = vector.shape_cast %67 : vector<8x16xf32> to vector<1x8x16xf32>
    tpu.vector_store %arg6[%c0_44, %c0_45, %c128], %70 {strides = array<i32>} : memref<1x8x256xf32, #tpu.memory_space<vmem>>, vector<1x8x16xf32>,
    %71 = vector.extract_strided_slice %34 {offsets = [0, 162], sizes = [8, 16], strides = [1, 1]} : vector<8x288xf32> to vector<8x16xf32>
    %c0_46 = arith.constant 0 : index
    %c0_47 = arith.constant 0 : index
    %c144 = arith.constant 144 : index
    %72 = vector.load %arg6[%c0_46, %c0_47, %c144] : memref<1x8x256xf32, #tpu.memory_space<vmem>>, vector<1x8x16xf32>
    %73 = vector.shape_cast %72 : vector<1x8x16xf32> to vector<8x16xf32>
    %74 = vector.shape_cast %71 : vector<8x16xf32> to vector<1x8x16xf32>
    tpu.vector_store %arg6[%c0_46, %c0_47, %c144], %74 {strides = array<i32>} : memref<1x8x256xf32, #tpu.memory_space<vmem>>, vector<1x8x16xf32>,
    %75 = vector.extract_strided_slice %34 {offsets = [0, 180], sizes = [8, 16], strides = [1, 1]} : vector<8x288xf32> to vector<8x16xf32>
    %c0_48 = arith.constant 0 : index
    %c0_49 = arith.constant 0 : index
    %c160 = arith.constant 160 : index
    %76 = vector.load %arg6[%c0_48, %c0_49, %c160] : memref<1x8x256xf32, #tpu.memory_space<vmem>>, vector<1x8x16xf32>
    %77 = vector.shape_cast %76 : vector<1x8x16xf32> to vector<8x16xf32>
    %78 = vector.shape_cast %75 : vector<8x16xf32> to vector<1x8x16xf32>
    tpu.vector_store %arg6[%c0_48, %c0_49, %c160], %78 {strides = array<i32>} : memref<1x8x256xf32, #tpu.memory_space<vmem>>, vector<1x8x16xf32>,
    %79 = vector.extract_strided_slice %34 {offsets = [0, 198], sizes = [8, 16], strides = [1, 1]} : vector<8x288xf32> to vector<8x16xf32>
    %c0_50 = arith.constant 0 : index
    %c0_51 = arith.constant 0 : index
    %c176 = arith.constant 176 : index
    %80 = vector.load %arg6[%c0_50, %c0_51, %c176] : memref<1x8x256xf32, #tpu.memory_space<vmem>>, vector<1x8x16xf32>
    %81 = vector.shape_cast %80 : vector<1x8x16xf32> to vector<8x16xf32>
    %82 = vector.shape_cast %79 : vector<8x16xf32> to vector<1x8x16xf32>
    tpu.vector_store %arg6[%c0_50, %c0_51, %c176], %82 {strides = array<i32>} : memref<1x8x256xf32, #tpu.memory_space<vmem>>, vector<1x8x16xf32>,
    %83 = vector.extract_strided_slice %34 {offsets = [0, 216], sizes = [8, 16], strides = [1, 1]} : vector<8x288xf32> to vector<8x16xf32>
    %c0_52 = arith.constant 0 : index
    %c0_53 = arith.constant 0 : index
    %c192 = arith.constant 192 : index
    %84 = vector.load %arg6[%c0_52, %c0_53, %c192] : memref<1x8x256xf32, #tpu.memory_space<vmem>>, vector<1x8x16xf32>
    %85 = vector.shape_cast %84 : vector<1x8x16xf32> to vector<8x16xf32>
    %86 = vector.shape_cast %83 : vector<8x16xf32> to vector<1x8x16xf32>
    tpu.vector_store %arg6[%c0_52, %c0_53, %c192], %86 {strides = array<i32>} : memref<1x8x256xf32, #tpu.memory_space<vmem>>, vector<1x8x16xf32>,
    %87 = vector.extract_strided_slice %34 {offsets = [0, 234], sizes = [8, 16], strides = [1, 1]} : vector<8x288xf32> to vector<8x16xf32>
    %c0_54 = arith.constant 0 : index
    %c0_55 = arith.constant 0 : index
    %c208 = arith.constant 208 : index
    %88 = vector.load %arg6[%c0_54, %c0_55, %c208] : memref<1x8x256xf32, #tpu.memory_space<vmem>>, vector<1x8x16xf32>
    %89 = vector.shape_cast %88 : vector<1x8x16xf32> to vector<8x16xf32>
    %90 = vector.shape_cast %87 : vector<8x16xf32> to vector<1x8x16xf32>
    tpu.vector_store %arg6[%c0_54, %c0_55, %c208], %90 {strides = array<i32>} : memref<1x8x256xf32, #tpu.memory_space<vmem>>, vector<1x8x16xf32>,
    %91 = vector.extract_strided_slice %34 {offsets = [0, 252], sizes = [8, 16], strides = [1, 1]} : vector<8x288xf32> to vector<8x16xf32>
    %c0_56 = arith.constant 0 : index
    %c0_57 = arith.constant 0 : index
    %c224 = arith.constant 224 : index
    %92 = vector.load %arg6[%c0_56, %c0_57, %c224] : memref<1x8x256xf32, #tpu.memory_space<vmem>>, vector<1x8x16xf32>
    %93 = vector.shape_cast %92 : vector<1x8x16xf32> to vector<8x16xf32>
    %94 = vector.shape_cast %91 : vector<8x16xf32> to vector<1x8x16xf32>
    tpu.vector_store %arg6[%c0_56, %c0_57, %c224], %94 {strides = array<i32>} : memref<1x8x256xf32, #tpu.memory_space<vmem>>, vector<1x8x16xf32>,
    %95 = vector.extract_strided_slice %34 {offsets = [0, 270], sizes = [8, 16], strides = [1, 1]} : vector<8x288xf32> to vector<8x16xf32>
    %c0_58 = arith.constant 0 : index
    %c0_59 = arith.constant 0 : index
    %c240 = arith.constant 240 : index
    %96 = vector.load %arg6[%c0_58, %c0_59, %c240] : memref<1x8x256xf32, #tpu.memory_space<vmem>>, vector<1x8x16xf32>
    %97 = vector.shape_cast %96 : vector<1x8x16xf32> to vector<8x16xf32>
    %98 = vector.shape_cast %95 : vector<8x16xf32> to vector<1x8x16xf32>
    tpu.vector_store %arg6[%c0_58, %c0_59, %c240], %98 {strides = array<i32>} : memref<1x8x256xf32, #tpu.memory_space<vmem>>, vector<1x8x16xf32>,
    return
  }
  func.func @transform_0(%arg0: i32, %arg1: i32) -> (i32, i32, i32, i32) {
    %c0_i32 = arith.constant 0 : i32
    %c0_i32_0 = arith.constant 0 : i32
    %c0_i32_1 = arith.constant 0 : i32
    return %arg0, %arg1, %c0_i32, %c0_i32_0 : i32, i32, i32, i32
  }
  func.func @transform_1(%arg0: i32, %arg1: i32) -> (i32, i32) {
    %c0_i32 = arith.constant 0 : i32
    %c0_i32_0 = arith.constant 0 : i32
    %c0_i32_1 = arith.constant 0 : i32
    return %c0_i32, %c0_i32_0 : i32, i32
  }
  func.func @transform_2(%arg0: i32, %arg1: i32) -> (i32, i32) {
    %c0_i32 = arith.constant 0 : i32
    %c0_i32_0 = arith.constant 0 : i32
    %c0_i32_1 = arith.constant 0 : i32
    return %c0_i32, %c0_i32_0 : i32, i32
  }
  func.func @transform_3(%arg0: i32, %arg1: i32) -> (i32, i32) {
    %c0_i32 = arith.constant 0 : i32
    %c0_i32_0 = arith.constant 0 : i32
    %c0_i32_1 = arith.constant 0 : i32
    return %c0_i32, %c0_i32_0 : i32, i32
  }
  func.func @transform_4(%arg0: i32, %arg1: i32) -> (i32, i32, i32) {
    %c0_i32 = arith.constant 0 : i32
    %c0_i32_0 = arith.constant 0 : i32
    return %arg0, %c0_i32, %arg1 : i32, i32, i32
  }
}

</mosaic_0001>

<bundles_post_ra>
// kernel: _conv_bn_elu_impl.2
= control target key start
LH: loop header
LB: loop body
LE: loop exit
PB: predicated region body
PF: predicated region fallthrough
CT: control target
= control target key end

     0   :  { %s782_s12 = smov 0   ;;  %s784_s13 = smov 0   ;;  %s849_s0 = inlined_call_operand.vmem [shape: f32[2,1,8,342], index: 0, kind: input, shape index: {}]   ;;  %s850_s1 = inlined_call_operand.vmem [shape: f32[8,72], index: 1, kind: input, shape index: {}]   ;;  %s851_s2 = inlined_call_operand.vmem [shape: f32[1,288], index: 2, kind: input, shape index: {}]   ;;  %s852_s3 = inlined_call_operand.vmem [shape: f32[2,8,2], index: 3, kind: output, shape index: {}]  }
   0x1   :  { %s786_s14 = smov 0  }
   0x2 LB: > { %s25_s15 = sadd.s32 1, %s745_s13  ;;  %p625_p0 = scmp.ge.s32.totalorder %s749_s14, 1  ;;  %s749_s14 = sphi %s786_s14, %s13_s14   ;;  %s745_s13 = sphi %s784_s13, %s854_s13   ;;  %s741_s12 = sphi %s782_s12, %s853_s12  }
   0x3   : > { %p27_p1 = scmp.ge.s32.totalorder %s25_s15, 2  ;;  %p157_p2 = scmp.lt.s32.totalorder %s749_s14, 3 }
   0x5   : > { %s856_s15 = smov (%p27_p1, %s25_s15), 0  ;;  %p158_p3 = pnand %p625_p0, %p157_p2 }
   0x6   : > { %p185_p4 = scmp.lt.s32.totalorder (!%p158_p3), %s741_s12, 1  ;;  %vm205_vm0 = vcmask (!%p158_p3), 261120   ;;  %s751_s20 = smov (!%p158_p3), 127   ;;  %v752_v3 = vmov (!%p158_p3), 0.0|0.0   ;;  %v759_v4 = vmov (!%p158_p3), 0.0   ;;  %vm760_vm1 = vmmov (!%p158_p3), 0  }
   0x7   : > { %161 = sbr.rel (%p158_p3) target bundleno = 701 (0x2bd), region = 32  ;;  %679 = vmatprep.subr.bf16.mxu1 (!%p158_p3), %v752_v3  ;;  %s753_s21 = smov (!%p158_p3), 126   ;;  %426 = vmatprep.mubr.f32.mxu0 (!%p158_p3), %v759_v4  ;;  %vm216_vm2 = vcmask (!%p158_p3), 1039360   ;;  %vm231_vm3 = vcmask (!%p158_p3), 1031168   ;;  %vm246_vm4 = vcmask (!%p158_p3), 900096   ;;  %vm261_vm5 = vcmask (!%p158_p3), 891904  }
   0x8   : > { %s754_s22 = smov (!%p158_p3), 110   ;;  %s755_s23 = smov (!%p158_p3), 109   ;;  %660 = vmatprep.mubr.msk.f32.mxu1 (!%p158_p3), %vm760_vm1, %v759_v4  ;;  %vm276_vm6 = vcmask (!%p158_p3), 883712   ;;  %vm291_vm7 = vcmask (!%p158_p3), 752640   ;;  %vm306_vm8 = vcmask (!%p158_p3), 744448   ;;  %vm321_vm9 = vcmask (!%p158_p3), 736256  }
   0x9   : > { %s756_s24 = smov (!%p158_p3), 108   ;;  %s757_s25 = smov (!%p158_p3), 92   ;;  %vm358_vm10 = vcmask (!%p158_p3), 588800   ;;  %vm535_vm11 = vcmask (!%p158_p3), 7168   ;;  %vm545_vm12 = vcmask (!%p158_p3), 15368  }
   0xa   : > { %s758_s26 = smov (!%p158_p3), 91   ;;  %s761_s27 = smov (!%p158_p3), 90  }
   0xe   : > { %s858_s12 = smov (!%p185_p4, %s741_s12), 1 }
   0xf   : > { %s691_s16 = smul.u32 24, %s858_s12  ;;  %s627_s5 = sshll.u32 %s858_s12, 3 }
  0x10   : > { %s198_s8 = scalar_lea.vmem %s852_s3, %s627_s5 }
  0x11   : > { %s193_s19 = scalar_lea.vmem %s849_s0, %s691_s16 }
  0x12   : > { %v201_v0 = vld [vmem:[%s193_s19 + $0x8] sm:$0xff]  ;;  %v200_v1 = vld [vmem:[%s193_s19] sm:$0xff]  ;;  %v202_v2 = vld [vmem:[%s193_s19 + $0x10] sm:$0xff] }
  0x13   : > { %212 = vrot.lane.b32.xlu0 %v201_v0, %s751_s20  ;;  %210 = vrot.lane.b32.xlu1 %v200_v1, %s751_s20  ;;  %206 = vst.msk [vmem:[#allocation2 + $0x10] sm:$0xff] %vm205_vm0, %v202_v2 }
  0x17   : > { %214 = vrot.lane.b32.xlu0 %v202_v2, %s751_s20  ;;  %227 = vrot.lane.b32.xlu1 %v201_v0, %s753_s21 }
  0x1a   : > { %v333_v16 = vld [vmem:[#allocation2 + $0x10] sm:$0xff] }
  0x1b   : > { %229 = vrot.lane.b32.xlu0 %v202_v2, %s753_s21  ;;  %242 = vrot.lane.b32.xlu1 %v201_v0, %s754_s22 }
  0x1f   : > { %244 = vrot.lane.b32.xlu0 %v202_v2, %s754_s22  ;;  %225 = vrot.lane.b32.xlu1 %v200_v1, %s753_s21 }
  0x23   : > { %240 = vrot.lane.b32.xlu0 %v200_v1, %s754_s22  ;;  %257 = vrot.lane.b32.xlu1 %v201_v0, %s755_s23 }
  0x27   : > { %259 = vrot.lane.b32.xlu0 %v202_v2, %s755_s23  ;;  %272 = vrot.lane.b32.xlu1 %v201_v0, %s756_s24 }
  0x2b   : > { %274 = vrot.lane.b32.xlu0 %v202_v2, %s756_s24  ;;  %255 = vrot.lane.b32.xlu1 %v200_v1, %s755_s23 }
  0x2f   : > { %270 = vrot.lane.b32.xlu0 %v200_v1, %s756_s24  ;;  %287 = vrot.lane.b32.xlu1 %v201_v0, %s757_s25 }
  0x33   : > { %289 = vrot.lane.b32.xlu0 %v202_v2, %s757_s25  ;;  %302 = vrot.lane.b32.xlu1 %v201_v0, %s758_s26 }
  0x37   : > { %304 = vrot.lane.b32.xlu0 %v202_v2, %s758_s26  ;;  %285 = vrot.lane.b32.xlu1 %v200_v1, %s757_s25 }
  0x3b   : > { %300 = vrot.lane.b32.xlu0 %v200_v1, %s758_s26  ;;  %317 = vrot.lane.b32.xlu1 %v201_v0, %s761_s27 }
  0x3f   : > { %319 = vrot.lane.b32.xlu0 %v202_v2, %s761_s27  ;;  %315 = vrot.lane.b32.xlu1 %v200_v1, %s761_s27 }
  0x85   : > { %v213_v5 = vpop.permute.xlu0 %212  ;;  %v211_v6 = vpop.permute.xlu1 %210 }
  0x86   : > { %v217_v7 = vsel %vm216_vm2, %v211_v6, %v213_v5 }
  0x87   : > { %v665_v12 = vpack.c.bf16 %v217_v7, %v200_v1  ;;  %v330_v1 = vld [vmem:[%s850_s1] sm:$0xff] }
  0x88   : > { %v503_v7 = vld [vmem:[%s851_s2] sm:$0x7] }
  0x89   : > { %v215_v8 = vpop.permute.xlu0 %214  ;;  %v228_v9 = vpop.permute.xlu1 %227 }
  0x8a   : > { %v218_v10 = vsel %vm216_vm2, %v213_v5, %v215_v8  ;;  %224 = vst.msk [vmem:[#allocation2 + $0x28] sm:$0xff] %vm205_vm0, %v215_v8 }
  0x8b   : > { %v663_v11 = vpack.c.bf16 %v218_v10, %v201_v0 }
  0x8d   : > { %v230_v13 = vpop.permute.xlu0 %229  ;;  %v243_v14 = vpop.permute.xlu1 %242  ;;  %664 = vmatprep.subr.bf16.mxu0 %v663_v11 }
  0x8e   : > { %v233_v15 = vsel %vm231_vm3, %v228_v9, %v230_v13  ;;  %239 = vst.msk [vmem:[#allocation2 + $0x40] sm:$0xff] %vm205_vm0, %v230_v13  ;;  %666 = vmatpush1.bf16.msra.mxu0 %v665_v12 }
  0x91   : > { %v245_v17 = vpop.permute.xlu0 %244  ;;  %v226_v18 = vpop.permute.xlu1 %225  ;;  %v336_v19 = vld [vmem:[#allocation2 + $0x28] sm:$0xff] }
  0x92   : > { %v248_v20 = vsel %vm246_vm4, %v243_v14, %v245_v17  ;;  %254 = vst.msk [vmem:[#allocation2 + $0x58] sm:$0xff] %vm205_vm0, %v245_v17  ;;  %v232_v21 = vsel %vm231_vm3, %v226_v18, %v228_v9  ;;  %v680_v22 = vpack.c.bf16 %v336_v19, %v333_v16 }
  0x93   : > { %v667_v23 = vpack.c.bf16 %v248_v20, %v233_v15 }
  0x94   : > { %681 = vmatpush3.bf16.msra.mxu1 %v680_v22 }
  0x95   : > { %v241_v24 = vpop.permute.xlu0 %240  ;;  %v258_v25 = vpop.permute.xlu1 %257  ;;  %682 = vmatprep.subr.bf16.mxu1 %v752_v3  ;;  %668 = vmatprep.subr.bf16.mxu0 %v667_v23  ;;  %v339_v30 = vld [vmem:[#allocation2 + $0x40] sm:$0xff] }
  0x96   : > { %v247_v26 = vsel %vm246_vm4, %v241_v24, %v243_v14 }
  0x97   : > { %v669_v27 = vpack.c.bf16 %v247_v26, %v232_v21 }
  0x99   : > { %v260_v28 = vpop.permute.xlu0 %259  ;;  %v273_v29 = vpop.permute.xlu1 %272  ;;  %v342_v31 = vld [vmem:[#allocation2 + $0x58] sm:$0xff]  ;;  %670 = vmatpush1.bf16.msra.mxu0 %v669_v27 }
  0x9a   : > { %v263_v32 = vsel %vm261_vm5, %v258_v25, %v260_v28  ;;  %269 = vst.msk [vmem:[#allocation2 + $0x70] sm:$0xff] %vm205_vm0, %v260_v28  ;;  %v683_v33 = vpack.c.bf16 %v342_v31, %v339_v30 }
  0x9c   : > { %684 = vmatpush3.bf16.msra.mxu1 %v683_v33 }
  0x9d   : > { %v275_v34 = vpop.permute.xlu0 %274  ;;  %v256_v35 = vpop.permute.xlu1 %255  ;;  %685 = vmatprep.subr.bf16.mxu1 %v752_v3 }
  0x9e   : > { %v278_v36 = vsel %vm276_vm6, %v273_v29, %v275_v34  ;;  %284 = vst.msk [vmem:[#allocation2 + $0x88] sm:$0xff] %vm205_vm0, %v275_v34  ;;  %v262_v37 = vsel %vm261_vm5, %v256_v35, %v258_v25 }
  0x9f   : > { %v671_v38 = vpack.c.bf16 %v278_v36, %v263_v32 }
  0xa1   : > { %v271_v39 = vpop.permute.xlu0 %270  ;;  %v288_v40 = vpop.permute.xlu1 %287  ;;  %672 = vmatprep.subr.bf16.mxu0 %v671_v38  ;;  %v345_v45 = vld [vmem:[#allocation2 + $0x70] sm:$0xff] }
  0xa2   : > { %v277_v41 = vsel %vm276_vm6, %v271_v39, %v273_v29 }
  0xa3   : > { %v673_v42 = vpack.c.bf16 %v277_v41, %v262_v37 }
  0xa5   : > { %v290_v43 = vpop.permute.xlu0 %289  ;;  %v303_v44 = vpop.permute.xlu1 %302  ;;  %v348_v46 = vld [vmem:[#allocation2 + $0x88] sm:$0xff]  ;;  %674 = vmatpush1.bf16.msra.mxu0 %v673_v42 }
  0xa6   : > { %v293_v47 = vsel %vm291_vm7, %v288_v40, %v290_v43  ;;  %299 = vst.msk [vmem:[#allocation2 + $0xa0] sm:$0xff] %vm205_vm0, %v290_v43  ;;  %v686_v48 = vpack.c.bf16 %v348_v46, %v345_v45 }
  0xa8   : > { %687 = vmatpush3.bf16.msra.mxu1 %v686_v48 }
  0xa9   : > { %v305_v49 = vpop.permute.xlu0 %304  ;;  %v286_v50 = vpop.permute.xlu1 %285  ;;  %688 = vmatprep.subr.bf16.mxu1 %v752_v3  ;;  %v505_v3 = vlaneseq }
  0xaa   : > { %v308_v51 = vsel %vm306_vm8, %v303_v44, %v305_v49  ;;  %314 = vst.msk [vmem:[#allocation2 + $0xb8] sm:$0xff] %vm205_vm0, %v305_v49  ;;  %v292_v52 = vsel %vm291_vm7, %v286_v50, %v288_v40 }
  0xab   : > { %v675_v53 = vpack.c.bf16 %v308_v51, %v293_v47  ;;  %v506_v5 = vshrl.u32 %v505_v3, 7 }
  0xad   : > { %v301_v54 = vpop.permute.xlu0 %300  ;;  %v318_v55 = vpop.permute.xlu1 %317  ;;  %676 = vmatprep.subr.bf16.mxu0 %v675_v53  ;;  %v351_v60 = vld [vmem:[#allocation2 + $0xa0] sm:$0xff]  ;;  %v507_v6 = vsub.s32 0, %v506_v5  ;;  %v511_v8 = vsub.s32 1, %v506_v5  ;;  %v515_v11 = vsub.s32 2, %v506_v5 }
  0xae   : > { %v307_v56 = vsel %vm306_vm8, %v301_v54, %v303_v44 }
  0xaf   : > { %v677_v57 = vpack.c.bf16 %v307_v56, %v292_v52  ;;  %v508_v9 = vrot.slane %v503_v7, %v507_v6  ;;  %v512_v10 = vrot.slane %v503_v7, %v511_v8  ;;  %v516_v15 = vrot.slane %v503_v7, %v515_v11 }
  0xb1   : > { %v320_v58 = vpop.permute.xlu0 %319  ;;  %v316_v59 = vpop.permute.xlu1 %315  ;;  %v354_v61 = vld [vmem:[#allocation2 + $0xb8] sm:$0xff]  ;;  %678 = vmatpush1.bf16.msra.mxu0 %v677_v57 }
  0xb2   : > { %v323_v62 = vsel %vm321_vm9, %v318_v55, %v320_v58  ;;  %329 = vst.msk [vmem:[#allocation2 + $0xd0] sm:$0xff] %vm205_vm0, %v320_v58  ;;  %v322_v63 = vsel %vm321_vm9, %v316_v59, %v318_v55  ;;  %v689_v0 = vpack.c.bf16 %v354_v61, %v351_v60 }
  0xb3   : > { %378 = vmatprep.subr.mxu0 %v323_v62 }
  0xb4   : > { %690 = vmatpush3.bf16.msra.mxu1 %v689_v0 }
  0xb5   : > { %658 = vmatprep.subr.mxu1 %v759_v4  ;;  %379 = vmatpush1.msra.mxu0 %v322_v63 }
  0xb6   : > { %628 = vmatmul.mubr.msk.f32.vlgmr.msra.gmra.mrb[0].mxu0 %vm358_vm10, %v330_v1 }
  0xb9   : > { %v357_v2 = vld [vmem:[#allocation2 + $0xd0] sm:$0xff] }
  0xba   : > { %659 = vmatpush3.msra.mxu1 %v357_v2 }
  0xbb   : > { %661 = vmatmul.mubr.msk.f32.vlgmr.msra.gmra.mrb[0].mxu1 %vm358_vm10, %v330_v1 }
 0x189   : > { %v428_v12 = vpop.f32.mrb[0].mxu0 }
 0x18a   : > { %v520_v13 = vmul.f32 %v508_v9, %v428_v12  ;;  %v430_v4 = vpop.f32.mrb[1].mxu0 }
 0x18b   : > { %v521_v14 = vmul.f32 %v512_v10, %v430_v4 }
 0x18d   : > { %v523_v16 = vadd.f32 %v521_v14, %v520_v13 }
 0x18e   : > { %v499_v17 = vpop.f32.mrb[0].mxu1 }
 0x18f   : > { %v522_v18 = vmul.f32 %v516_v15, %v499_v17  ;;  %v662_v19 = vpop.f32.mrb[1].mxu1 }
 0x191   : > { %v524_v20 = vsel %vm205_vm0, %v522_v18, 0.0 }
 0x192   : > { %v525_v21 = vadd.f32 %v524_v20, %v523_v16 }
 0x194   : > { %526 = vadd.xlane.f32.xlu0 %v525_v21 }
 0x221   : > { %v527_v22 = vpop.xlane.xlu0 %526 }
 0x222   : > { %v528_v23 = vmul.f32 0.00390625, %v527_v22  ;;  %536 = vst.msk [vmem:[%s198_s8] sm:$0xff] %vm535_vm11, %v527_v22 }
 0x224   : > { %v529_v24 = vsub.f32 %v428_v12, %v528_v23  ;;  %v530_v25 = vsub.f32 %v430_v4, %v528_v23  ;;  %v531_v26 = vsub.f32 %v499_v17, %v528_v23 }
 0x226   : > { %v532_v27 = vmul.f32 %v529_v24, %v508_v9  ;;  %v533_v28 = vmul.f32 %v530_v25, %v512_v10  ;;  %v534_v29 = vmul.f32 %v531_v26, %v516_v15 }
 0x228   : > { %v537_v30 = vmul.f32 %v532_v27, %v532_v27  ;;  %v538_v31 = vmul.f32 %v533_v28, %v533_v28  ;;  %v539_v32 = vmul.f32 %v534_v29, %v534_v29 }
 0x22a   : > { %v540_v33 = vadd.f32 %v538_v31, %v537_v30  ;;  %v541_v34 = vsel %vm205_vm0, %v539_v32, 0.0 }
 0x22c   : > { %v542_v35 = vadd.f32 %v541_v34, %v540_v33 }
 0x22e   : > { %543 = vadd.xlane.f32.xlu1 %v542_v35 }
 0x2bb   : > { %v544_v36 = vpop.xlane.xlu1 %543 }
 0x2bc   : > { %546 = vst.msk [vmem:[%s198_s8] sm:$0xff] %vm545_vm12, %v544_v36 }
 0x2bd PF: > { %s13_s14 = sadd.s32 1, %s749_s14   ;;  %s853_s12 = smov %s745_s13 }
 0x2be   : > { %p10_p5 = scmp.ge.s32.totalorder %s13_s14, 4   ;;  %s854_s13 = smov %s856_s15 }
 0x2c0   :  { %12 = sbr.rel (!%p10_p5) target bundleno = 2 (0x2), region = 62 }

// kernel: _conv_bn_elu_impl.3
= control target key start
LH: loop header
LB: loop body
LE: loop exit
PB: predicated region body
PF: predicated region fallthrough
CT: control target
= control target key end

     0   :  { %s946_s15 = smov 0   ;;  %s948_s16 = smov 0   ;;  %s1069_s0 = inlined_call_operand.vmem [shape: f32[2,1,8,342], index: 0, kind: input, shape index: {}]   ;;  %s1070_s1 = inlined_call_operand.vmem [shape: f32[8,72], index: 1, kind: input, shape index: {}]   ;;  %s1071_s2 = inlined_call_operand.vmem [shape: f32[8,1], index: 2, kind: input, shape index: {}]   ;;  %s1072_s3 = inlined_call_operand.vmem [shape: f32[8,1], index: 3, kind: input, shape index: {}]   ;;  %s1073_s4 = inlined_call_operand.vmem [shape: f32[2,8,256], index: 4, kind: output, shape index: {}]  }
   0x1   :  { %s950_s17 = smov 0  }
   0x2 LB: > { %s26_s18 = sadd.s32 1, %s891_s16  ;;  %p745_p0 = scmp.ge.s32.totalorder %s895_s17, 1  ;;  %s895_s17 = sphi %s950_s17, %s14_s17   ;;  %s891_s16 = sphi %s948_s16, %s1075_s16   ;;  %s887_s15 = sphi %s946_s15, %s1074_s15  }
   0x3   : > { %p28_p1 = scmp.ge.s32.totalorder %s26_s18, 2  ;;  %p182_p2 = scmp.lt.s32.totalorder %s895_s17, 3 }
   0x5   : > { %s1077_s18 = smov (%p28_p1, %s26_s18), 0  ;;  %p183_p3 = pnand %p745_p0, %p182_p2 }
   0x6   : > { %p216_p4 = scmp.lt.s32.totalorder (!%p183_p3), %s887_s15, 1  ;;  %vm240_vm0 = vcmask (!%p183_p3), 261120   ;;  %s897_s23 = smov (!%p183_p3), 127   ;;  %v898_v3 = vmov (!%p183_p3), 0.0|0.0   ;;  %v905_v4 = vmov (!%p183_p3), 0.0   ;;  %vm906_vm1 = vmmov (!%p183_p3), 0  }
   0x7   : > { %186 = sbr.rel (%p183_p3) target bundleno = 567 (0x237), region = 36  ;;  %804 = vmatprep.subr.bf16.mxu1 (!%p183_p3), %v898_v3  ;;  %s899_s24 = smov (!%p183_p3), 126   ;;  %461 = vmatprep.mubr.f32.mxu0 (!%p183_p3), %v905_v4  ;;  %v908_v5 = vmov (!%p183_p3), 0   ;;  %v538_v6 = vld [vmem:[%s1071_s2] sm:$0xff] (!%p183_p3)  ;;  %vm251_vm2 = vcmask (!%p183_p3), 1039360   ;;  %vm266_vm3 = vcmask (!%p183_p3), 1031168  }
   0x8   : > { %s900_s25 = smov (!%p183_p3), 110   ;;  %s901_s26 = smov (!%p183_p3), 109   ;;  %785 = vmatprep.mubr.msk.f32.mxu1 (!%p183_p3), %vm906_vm1, %v905_v4  ;;  %865 = vset.pattern.permute.xlu0 (!%p183_p3), %v908_v5  ;;  %v547_v7 = vld [vmem:[%s1072_s3] sm:$0xff] (!%p183_p3)  ;;  %vm281_vm4 = vcmask (!%p183_p3), 900096   ;;  %vm296_vm5 = vcmask (!%p183_p3), 891904   ;;  %vm311_vm6 = vcmask (!%p183_p3), 883712  }
   0x9   : > { %s902_s27 = smov (!%p183_p3), 108   ;;  %s903_s28 = smov (!%p183_p3), 92   ;;  %866 = vset.pattern.permute.xlu1 (!%p183_p3), %v908_v5  ;;  %vm326_vm7 = vcmask (!%p183_p3), 752640   ;;  %vm341_vm8 = vcmask (!%p183_p3), 744448   ;;  %vm356_vm9 = vcmask (!%p183_p3), 736256   ;;  %v365_v5 = vld [vmem:[%s1070_s1] sm:$0xff] (!%p183_p3) }
   0xa   : > { %s904_s29 = smov (!%p183_p3), 91   ;;  %s907_s30 = smov (!%p183_p3), 90   ;;  %vm393_vm10 = vcmask (!%p183_p3), 588800   ;;  %vm571_vm11 = vcmask (!%p183_p3), 130048   ;;  %vm577_vm15 = vcmask (!%p183_p3), 261248   ;;  %vm587_vm1 = vcmask (!%p183_p3), 523648  }
   0xb   : > { %s911_s20 = smov (!%p183_p3), 122   ;;  %s912_s21 = smov (!%p183_p3), 114  }
   0xc   : > { %s920_s5 = smov (!%p183_p3), 98  }
   0xe   : > { %s1079_s15 = smov (!%p216_p4, %s887_s15), 1 }
   0xf   : > { %s816_s19 = smul.u32 24, %s1079_s15  ;;  %s756_s11 = sshll.u32 %s1079_s15, 4 }
  0x10   : > { %s1025_s14 = scalar_lea.vmem %s1073_s4, %s756_s11  ;;  %s909_s15 = smov 124  }
  0x11   : > { %s224_s22 = scalar_lea.vmem %s1069_s0, %s816_s19  ;;  %s910_s19 = smov 100  }
  0x12   : > { %v236_v0 = vld [vmem:[%s224_s22 + $0x8] sm:$0xff]  ;;  %v970_v1 = vld [vmem:[%s224_s22] sm:$0xff]  ;;  %v237_v2 = vld [vmem:[%s224_s22 + $0x10] sm:$0xff]  ;;  %s913_s22 = smov 120  }
  0x13   : > { %247 = vrot.lane.b32.xlu0 %v236_v0, %s897_s23  ;;  %245 = vrot.lane.b32.xlu1 %v970_v1, %s897_s23  ;;  %241 = vst.msk [vmem:[#allocation2 + $0x10] sm:$0xff] %vm240_vm0, %v237_v2 }
  0x17   : > { %249 = vrot.lane.b32.xlu0 %v237_v2, %s897_s23  ;;  %262 = vrot.lane.b32.xlu1 %v236_v0, %s899_s24  ;;  %s914_s23 = smov 112  }
  0x1a   : > { %v368_v19 = vld [vmem:[#allocation2 + $0x10] sm:$0xff] }
  0x1b   : > { %264 = vrot.lane.b32.xlu0 %v237_v2, %s899_s24  ;;  %277 = vrot.lane.b32.xlu1 %v236_v0, %s900_s25 }
  0x1f   : > { %279 = vrot.lane.b32.xlu0 %v237_v2, %s900_s25  ;;  %260 = vrot.lane.b32.xlu1 %v970_v1, %s899_s24 }
  0x23   : > { %275 = vrot.lane.b32.xlu0 %v970_v1, %s900_s25  ;;  %292 = vrot.lane.b32.xlu1 %v236_v0, %s901_s26 }
  0x27   : > { %294 = vrot.lane.b32.xlu0 %v237_v2, %s901_s26  ;;  %307 = vrot.lane.b32.xlu1 %v236_v0, %s902_s27 }
  0x2b   : > { %309 = vrot.lane.b32.xlu0 %v237_v2, %s902_s27  ;;  %290 = vrot.lane.b32.xlu1 %v970_v1, %s901_s26  ;;  %s916_s26 = smov 116  }
  0x2f   : > { %305 = vrot.lane.b32.xlu0 %v970_v1, %s902_s27  ;;  %322 = vrot.lane.b32.xlu1 %v236_v0, %s903_s28 }
  0x33   : > { %324 = vrot.lane.b32.xlu0 %v237_v2, %s903_s28  ;;  %337 = vrot.lane.b32.xlu1 %v236_v0, %s904_s29 }
  0x37   : > { %339 = vrot.lane.b32.xlu0 %v237_v2, %s904_s29  ;;  %320 = vrot.lane.b32.xlu1 %v970_v1, %s903_s28  ;;  %s917_s28 = smov 106  }
  0x3b   : > { %335 = vrot.lane.b32.xlu0 %v970_v1, %s904_s29  ;;  %352 = vrot.lane.b32.xlu1 %v236_v0, %s907_s30  ;;  %s918_s29 = smov 104  }
  0x3f   : > { %354 = vrot.lane.b32.xlu0 %v237_v2, %s907_s30  ;;  %350 = vrot.lane.b32.xlu1 %v970_v1, %s907_s30  ;;  %s919_s30 = smov 102  }
  0x43   : > { %541 = vperm.xlu0 %865, %v538_v6   ;;  %550 = vperm.xlu1 %866, %v547_v7  }
  0x85   : > { %v248_v8 = vpop.permute.xlu0 %247  ;;  %v246_v9 = vpop.permute.xlu1 %245 }
  0x86   : > { %v252_v10 = vsel %vm251_vm2, %v246_v9, %v248_v8 }
  0x87   : > { %v790_v15 = vpack.c.bf16 %v252_v10, %v970_v1 }
  0x89   : > { %v250_v11 = vpop.permute.xlu0 %249  ;;  %v263_v12 = vpop.permute.xlu1 %262 }
  0x8a   : > { %v253_v13 = vsel %vm251_vm2, %v248_v8, %v250_v11  ;;  %259 = vst.msk [vmem:[#allocation2 + $0x28] sm:$0xff] %vm240_vm0, %v250_v11  ;;  %vm592_vm2 = vcmask 654848  }
  0x8b   : > { %v788_v14 = vpack.c.bf16 %v253_v13, %v236_v0 }
  0x8d   : > { %v265_v16 = vpop.permute.xlu0 %264  ;;  %v278_v17 = vpop.permute.xlu1 %277  ;;  %789 = vmatprep.subr.bf16.mxu0 %v788_v14 }
  0x8e   : > { %v268_v18 = vsel %vm266_vm3, %v263_v12, %v265_v16  ;;  %274 = vst.msk [vmem:[#allocation2 + $0x40] sm:$0xff] %vm240_vm0, %v265_v16  ;;  %791 = vmatpush1.bf16.msra.mxu0 %v790_v15 }
  0x91   : > { %v280_v20 = vpop.permute.xlu0 %279  ;;  %v261_v21 = vpop.permute.xlu1 %260  ;;  %v371_v22 = vld [vmem:[#allocation2 + $0x28] sm:$0xff] }
  0x92   : > { %v283_v23 = vsel %vm281_vm4, %v278_v17, %v280_v20  ;;  %289 = vst.msk [vmem:[#allocation2 + $0x58] sm:$0xff] %vm240_vm0, %v280_v20  ;;  %v267_v24 = vsel %vm266_vm3, %v261_v21, %v263_v12  ;;  %v805_v25 = vpack.c.bf16 %v371_v22, %v368_v19  ;;  %vm597_vm3 = vcmask 786048  }
  0x93   : > { %v792_v26 = vpack.c.bf16 %v283_v23, %v268_v18 }
  0x94   : > { %806 = vmatpush3.bf16.msra.mxu1 %v805_v25 }
  0x95   : > { %v276_v27 = vpop.permute.xlu0 %275  ;;  %v293_v28 = vpop.permute.xlu1 %292  ;;  %807 = vmatprep.subr.bf16.mxu1 %v898_v3  ;;  %793 = vmatprep.subr.bf16.mxu0 %v792_v26  ;;  %v374_v33 = vld [vmem:[#allocation2 + $0x40] sm:$0xff] }
  0x96   : > { %v282_v29 = vsel %vm281_vm4, %v276_v27, %v278_v17  ;;  %vm602_vm4 = vcmask 917248  }
  0x97   : > { %v794_v30 = vpack.c.bf16 %v282_v29, %v267_v24 }
  0x99   : > { %v295_v31 = vpop.permute.xlu0 %294  ;;  %v308_v32 = vpop.permute.xlu1 %307  ;;  %v377_v34 = vld [vmem:[#allocation2 + $0x58] sm:$0xff]  ;;  %795 = vmatpush1.bf16.msra.mxu0 %v794_v30 }
  0x9a   : > { %v298_v35 = vsel %vm296_vm5, %v293_v28, %v295_v31  ;;  %304 = vst.msk [vmem:[#allocation2 + $0x70] sm:$0xff] %vm240_vm0, %v295_v31  ;;  %v808_v36 = vpack.c.bf16 %v377_v34, %v374_v33 }
  0x9c   : > { %809 = vmatpush3.bf16.msra.mxu1 %v808_v36 }
  0x9d   : > { %v310_v37 = vpop.permute.xlu0 %309  ;;  %v291_v38 = vpop.permute.xlu1 %290  ;;  %810 = vmatprep.subr.bf16.mxu1 %v898_v3 }
  0x9e   : > { %v313_v39 = vsel %vm311_vm6, %v308_v32, %v310_v37  ;;  %319 = vst.msk [vmem:[#allocation2 + $0x88] sm:$0xff] %vm240_vm0, %v310_v37  ;;  %v297_v40 = vsel %vm296_vm5, %v291_v38, %v293_v28  ;;  %vm609_vm5 = vcmask 932864  }
  0x9f   : > { %v796_v41 = vpack.c.bf16 %v313_v39, %v298_v35 }
  0xa1   : > { %v306_v42 = vpop.permute.xlu0 %305  ;;  %v323_v43 = vpop.permute.xlu1 %322  ;;  %797 = vmatprep.subr.bf16.mxu0 %v796_v41  ;;  %v380_v48 = vld [vmem:[#allocation2 + $0x70] sm:$0xff] }
  0xa2   : > { %v312_v44 = vsel %vm311_vm6, %v306_v42, %v308_v32  ;;  %vm612_vm6 = vcmask 1048448  }
  0xa3   : > { %v798_v45 = vpack.c.bf16 %v312_v44, %v297_v40 }
  0xa5   : > { %v325_v46 = vpop.permute.xlu0 %324  ;;  %v338_v47 = vpop.permute.xlu1 %337  ;;  %v383_v49 = vld [vmem:[#allocation2 + $0x88] sm:$0xff]  ;;  %799 = vmatpush1.bf16.msra.mxu0 %v798_v45 }
  0xa6   : > { %v328_v50 = vsel %vm326_vm7, %v323_v43, %v325_v46  ;;  %334 = vst.msk [vmem:[#allocation2 + $0xa0] sm:$0xff] %vm240_vm0, %v325_v46  ;;  %v811_v51 = vpack.c.bf16 %v383_v49, %v380_v48 }
  0xa8   : > { %812 = vmatpush3.bf16.msra.mxu1 %v811_v51 }
  0xa9   : > { %v340_v52 = vpop.permute.xlu0 %339  ;;  %v321_v53 = vpop.permute.xlu1 %320  ;;  %813 = vmatprep.subr.bf16.mxu1 %v898_v3 }
  0xaa   : > { %v343_v54 = vsel %vm341_vm8, %v338_v47, %v340_v52  ;;  %349 = vst.msk [vmem:[#allocation2 + $0xb8] sm:$0xff] %vm240_vm0, %v340_v52  ;;  %v327_v55 = vsel %vm326_vm7, %v321_v53, %v323_v43  ;;  %vm643_vm7 = vcmask 818176  }
  0xab   : > { %v800_v56 = vpack.c.bf16 %v343_v54, %v328_v50 }
  0xad   : > { %v336_v57 = vpop.permute.xlu0 %335  ;;  %v353_v58 = vpop.permute.xlu1 %352  ;;  %801 = vmatprep.subr.bf16.mxu0 %v800_v56  ;;  %v386_v63 = vld [vmem:[#allocation2 + $0xa0] sm:$0xff] }
  0xae   : > { %v342_v59 = vsel %vm341_vm8, %v336_v57, %v338_v47 }
  0xaf   : > { %v802_v60 = vpack.c.bf16 %v342_v59, %v327_v55 }
  0xb1   : > { %v355_v61 = vpop.permute.xlu0 %354  ;;  %v351_v62 = vpop.permute.xlu1 %350  ;;  %v389_v0 = vld [vmem:[#allocation2 + $0xb8] sm:$0xff]  ;;  %803 = vmatpush1.bf16.msra.mxu0 %v802_v60 }
  0xb2   : > { %v358_v1 = vsel %vm356_vm9, %v353_v58, %v355_v61  ;;  %364 = vst.msk [vmem:[#allocation2 + $0xd0] sm:$0xff] %vm240_vm0, %v355_v61  ;;  %v357_v2 = vsel %vm356_vm9, %v351_v62, %v353_v58  ;;  %v814_v3 = vpack.c.bf16 %v389_v0, %v386_v63  ;;  %vm582_vm0 = vcmask 392448  }
  0xb3   : > { %413 = vmatprep.subr.mxu0 %v358_v1 }
  0xb4   : > { %815 = vmatpush3.bf16.msra.mxu1 %v814_v3 }
  0xb5   : > { %783 = vmatprep.subr.mxu1 %v905_v4  ;;  %414 = vmatpush1.msra.mxu0 %v357_v2 }
  0xb6   : > { %749 = vmatmul.mubr.msk.f32.vlgmr.msra.gmra.mrb[0].mxu0 %vm393_vm10, %v365_v5 }
  0xb9   : > { %v392_v6 = vld [vmem:[#allocation2 + $0xd0] sm:$0xff] }
  0xba   : > { %784 = vmatpush3.msra.mxu1 %v392_v6 }
  0xbb   : > { %786 = vmatmul.mubr.msk.f32.vlgmr.msra.gmra.mrb[0].mxu1 %vm393_vm10, %v365_v5 }
  0xc2   : > { %v542_v7 = vpop.permute.xlu0 %541  ;;  %v551_v8 = vpop.permute.xlu1 %550 }
 0x189   : > { %v463_v9 = vpop.f32.mrb[0].mxu0 }
 0x18a   : > { %v544_v10 = vmul.f32 %v542_v7, %v463_v9  ;;  %v465_v11 = vpop.f32.mrb[1].mxu0 }
 0x18b   : > { %v545_v13 = vmul.f32 %v542_v7, %v465_v11 }
 0x18c   : > { %v553_v12 = vadd.f32 %v551_v8, %v544_v10 }
 0x18d   : > { %v554_v4 = vadd.f32 %v551_v8, %v545_v13 }
 0x18e   : > { %v534_v14 = vpop.f32.mrb[0].mxu1  ;;  %v559_v15 = vmul.f32 1.442695, %v553_v12  ;;  %vm556_vm12 = vcmp.gt.f32.partialorder %v553_v12, 0.0 }
 0x18f   : > { %v546_v16 = vmul.f32 %v542_v7, %v534_v14  ;;  %v787_v17 = vpop.f32.mrb[1].mxu1  ;;  %v561_v20 = vmul.f32 1.442695, %v554_v4  ;;  %vm557_vm14 = vcmp.gt.f32.partialorder %v554_v4, 0.0 }
 0x190   : > { %867 = vpow2.f32 %v559_v15 }
 0x191   : > { %v555_v18 = vadd.f32 %v551_v8, %v546_v16 }
 0x193   : > { %v563_v19 = vmul.f32 1.442695, %v555_v18  ;;  %vm558_vm13 = vcmp.gt.f32.partialorder %v555_v18, 0.0 }
 0x195   : > { %869 = vpow2.f32 %v563_v19 }
 0x196   : > { %871 = vpow2.f32 %v561_v20 }
 0x19a   : > { %v868_v21 = vpop.eup %867 }
 0x19b   : > { %v751_v22 = vadd.f32 -1.0, %v868_v21 }
 0x19d   : > { %v568_v23 = vsel %vm556_vm12, %v553_v12, %v751_v22 }
 0x19e   : > { %574 = vrot.lane.b32.xlu0 %v568_v23, %s899_s24  ;;  %572 = vst.msk [vmem:[%s1025_s14] sm:$0xff] %vm571_vm11, %v568_v23  ;;  %s915_s24 = smov 118  }
 0x19f   : > { %v870_v24 = vpop.eup %869 }
 0x1a0   : > { %v753_v25 = vadd.f32 -1.0, %v870_v24  ;;  %v872_v27 = vpop.eup %871 }
 0x1a1   : > { %v752_v28 = vadd.f32 -1.0, %v872_v27 }
 0x1a2   : > { %v570_v26 = vsel %vm558_vm13, %v555_v18, %v753_v25  ;;  %579 = vrot.lane.b32.xlu0 %v568_v23, %s909_s15 }
 0x1a3   : > { %641 = vrot.lane.b32.xlu1 %v570_v26, %s910_s19  ;;  %v569_v29 = vsel %vm557_vm14, %v554_v4, %v752_v28 }
 0x1a6   : > { %584 = vrot.lane.b32.xlu0 %v568_v23, %s911_s20 }
 0x1a7   : > { %605 = vrot.lane.b32.xlu1 %v568_v23, %s912_s21 }
 0x1aa   : > { %589 = vrot.lane.b32.xlu0 %v568_v23, %s913_s22 }
 0x1ab   : > { %614 = vrot.lane.b32.xlu1 %v569_v29, %s914_s23 }
 0x1ae   : > { %594 = vrot.lane.b32.xlu0 %v568_v23, %s915_s24 }
 0x1af   : > { %618 = vrot.lane.b32.xlu1 %v569_v29, %s900_s25 }
 0x1b2   : > { %599 = vrot.lane.b32.xlu0 %v568_v23, %s916_s26 }
 0x1b3   : > { %622 = vrot.lane.b32.xlu1 %v569_v29, %s902_s27 }
 0x1b6   : > { %639 = vrot.lane.b32.xlu0 %v569_v29, %s910_s19 }
 0x1b7   : > { %626 = vrot.lane.b32.xlu1 %v569_v29, %s917_s28 }
 0x1ba   : > { %607 = vrot.lane.b32.xlu0 %v569_v29, %s912_s21 }
 0x1bb   : > { %630 = vrot.lane.b32.xlu1 %v569_v29, %s918_s29 }
 0x1bf   : > { %634 = vrot.lane.b32.xlu1 %v569_v29, %s919_s30 }
 0x1c3   : > { %647 = vrot.lane.b32.xlu1 %v570_v26, %s920_s5 }
 0x210   : > { %v575_v30 = vpop.permute.xlu0 %574 }
 0x211   : > { %578 = vst.msk [vmem:[%s1025_s14] sm:$0xff] %vm577_vm15, %v575_v30 }
 0x214   : > { %v580_v31 = vpop.permute.xlu0 %579 }
 0x215   : > { %v642_v32 = vpop.permute.xlu1 %641  ;;  %583 = vst.msk [vmem:[%s1025_s14] sm:$0xff] %vm582_vm0, %v580_v31 }
 0x218   : > { %v585_v33 = vpop.permute.xlu0 %584 }
 0x219   : > { %v606_v34 = vpop.permute.xlu1 %605  ;;  %588 = vst.msk [vmem:[%s1025_s14] sm:$0xff] %vm587_vm1, %v585_v33 }
 0x21c   : > { %v590_v35 = vpop.permute.xlu0 %589 }
 0x21d   : > { %v615_v36 = vpop.permute.xlu1 %614  ;;  %593 = vst.msk [vmem:[%s1025_s14] sm:$0xff] %vm592_vm2, %v590_v35 }
 0x21e   : > { %617 = vst.msk [vmem:[%s1025_s14 + $0x8] sm:$0xff] %vm571_vm11, %v615_v36 }
 0x220   : > { %v595_v37 = vpop.permute.xlu0 %594 }
 0x221   : > { %v619_v38 = vpop.permute.xlu1 %618  ;;  %598 = vst.msk [vmem:[%s1025_s14] sm:$0xff] %vm597_vm3, %v595_v37 }
 0x222   : > { %621 = vst.msk [vmem:[%s1025_s14 + $0x8] sm:$0xff] %vm577_vm15, %v619_v38 }
 0x224   : > { %v600_v39 = vpop.permute.xlu0 %599 }
 0x225   : > { %v623_v40 = vpop.permute.xlu1 %622  ;;  %603 = vst.msk [vmem:[%s1025_s14] sm:$0xff] %vm602_vm4, %v600_v39 }
 0x226   : > { %625 = vst.msk [vmem:[%s1025_s14 + $0x8] sm:$0xff] %vm582_vm0, %v623_v40 }
 0x228   : > { %v640_v41 = vpop.permute.xlu0 %639 }
 0x229   : > { %v627_v42 = vpop.permute.xlu1 %626  ;;  %v644_v47 = vsel %vm643_vm7, %v640_v41, %v642_v32 }
 0x22a   : > { %629 = vst.msk [vmem:[%s1025_s14 + $0x8] sm:$0xff] %vm587_vm1, %v627_v42 }
 0x22c   : > { %v608_v43 = vpop.permute.xlu0 %607 }
 0x22d   : > { %v631_v44 = vpop.permute.xlu1 %630  ;;  %v610_v45 = vsel %vm609_vm5, %v606_v34, %v608_v43 }
 0x22e   : > { %633 = vst.msk [vmem:[%s1025_s14 + $0x8] sm:$0xff] %vm592_vm2, %v631_v44 }
 0x22f   : > { %613 = vst.msk [vmem:[%s1025_s14] sm:$0xff] %vm612_vm6, %v610_v45 }
 0x231   : > { %v635_v46 = vpop.permute.xlu1 %634 }
 0x232   : > { %637 = vst.msk [vmem:[%s1025_s14 + $0x8] sm:$0xff] %vm597_vm3, %v635_v46 }
 0x233   : > { %646 = vst.msk [vmem:[%s1025_s14 + $0x8] sm:$0xff] %vm602_vm4, %v644_v47 }
 0x235   : > { %v648_v48 = vpop.permute.xlu1 %647 }
 0x236   : > { %650 = vst.msk [vmem:[%s1025_s14 + $0x8] sm:$0xff] %vm612_vm6, %v648_v48 }
 0x237 PF: > { %s14_s17 = sadd.s32 1, %s895_s17   ;;  %s1074_s15 = smov %s891_s16 }
 0x238   : > { %p11_p5 = scmp.ge.s32.totalorder %s14_s17, 4   ;;  %s1075_s16 = smov %s1077_s18 }
 0x23a   :  { %13 = sbr.rel (!%p11_p5) target bundleno = 2 (0x2), region = 66 }

</bundles_post_ra>
